<compile_context>
chip_gen: v7x
topology: tpu7x:2x2x1
jax: 0.10.0
libtpu: 0.0.40
codegen_flags: <defaults>
</compile_context>

<pallas_src>
import functools

import jax
import jax.numpy as jnp
from jax.experimental import pallas as pl
from jax.experimental.pallas import tpu as pltpu


def _sigmoid(z):
    # Exact sigmoid with a single EUP (tanh) push per vreg; no VPU divide,
    # no approx-reciprocal error.
    return 0.5 * jnp.tanh(0.5 * z) + 0.5


def autoencoder_kernel(x_ref, w1_ref, b1_ref, w2_ref, b2_ref, o_ref):
    # Compute dtype follows the weights (bf16 weights -> bf16 MXU rate);
    # accumulation stays f32 via preferred_element_type.
    cdt = w1_ref.dtype
    x = x_ref[...].astype(cdt)

    # First linear (MXU, f32 accumulate) + sigmoid (EUP).
    h = jnp.dot(x, w1_ref[...], preferred_element_type=jnp.float32)
    h = _sigmoid(h + b1_ref[...].astype(jnp.float32))   # (1, K) broadcasts over rows

    # Second linear (MXU, f32 accumulate) + sigmoid (EUP).
    y = jnp.dot(h.astype(cdt), w2_ref[...], preferred_element_type=jnp.float32)
    y = _sigmoid(y + b2_ref[...].astype(jnp.float32))   # (1, Q) broadcasts over rows

    o_ref[...] = y.astype(o_ref.dtype)


def _round_up8(n):
    return max(8, ((n + 7) // 8) * 8)


def _choose_tb(B, Q, x_dtype, out_dtype, *, max_tb=1024, tile_budget=24 << 20):
    """Largest batch tile (multiple of 8) that keeps >= 4 grid steps when the
    batch allows it (>= 2 steps per TC on v7x => real double-buffering) and
    whose double-buffered x/out tiles fit the VMEM tile budget."""
    if B <= 32:
        return _round_up8(B)                      # too small to split into >= 4 steps
    tb = _round_up8(min(max_tb, B // 4))          # >= 4 grid steps
    per_row = 2 * Q * (jnp.dtype(x_dtype).itemsize + jnp.dtype(out_dtype).itemsize)
    while tb > 8 and tb * per_row > tile_budget:
        tb = _round_up8(tb // 2)
    return tb


def _vmem_limit_bytes(tb, Q, K, x_dtype, w_dtype, out_dtype):
    bpe = lambda dt: jnp.dtype(dt).itemsize
    xio = 2 * tb * Q * (bpe(x_dtype) + bpe(out_dtype))        # double-buffered x/out tiles
    wts = 2 * (2 * Q * K + K + Q) * bpe(w_dtype)              # (double-buffered) resident weights
    scr = 4 * tb * max(K, Q) * 4                              # f32 intermediates headroom
    limit = int(1.5 * (xio + wts + scr)) + (4 << 20)
    # <= 48 MiB keeps double-buffering intact on v7x (64 MiB physical);
    # also comfortably above v5e's 16 MiB scoped default.
    return max(16 << 20, min(limit, 48 << 20))


def autoencoder_forward(x, w1, b1, w2, b2, *, tb=None):
    """x: [B, Q], w1: [Q, K], b1: [1, K], w2: [K, Q], b2: [1, Q] -> [B, Q]."""
    B, Q = x.shape
    K = w1.shape[1]
    out_dtype = x.dtype

    if tb is None:
        tb = _choose_tb(B, Q, x.dtype, out_dtype)
    tb = _round_up8(tb)
    grid = (pl.cdiv(B, tb),)                      # partial tail block handled by Pallas

    itemsize = lambda a: a.size * a.dtype.itemsize
    bytes_accessed = (itemsize(x) + itemsize(w1) + itemsize(w2)
                      + itemsize(b1) + itemsize(b2)
                      + B * Q * jnp.dtype(out_dtype).itemsize)
    cost = pl.CostEstimate(
        flops=4 * B * Q * K,                      # two GEMMs: 2*B*Q*K each
        transcendentals=B * (K + Q),              # one tanh per hidden/output element
        bytes_accessed=int(bytes_accessed),
    )

    return pl.pallas_call(
        autoencoder_kernel,
        out_shape=jax.ShapeDtypeStruct((B, Q), out_dtype),
        grid=grid,
        in_specs=[
            pl.BlockSpec((tb, Q), lambda i: (i, 0)),   # x: tiled over batch
            pl.BlockSpec((Q, K), lambda i: (0, 0)),    # W1: resident in VMEM
            pl.BlockSpec((1, K), lambda i: (0, 0)),    # b1: resident
            pl.BlockSpec((K, Q), lambda i: (0, 0)),    # W2: resident
            pl.BlockSpec((1, Q), lambda i: (0, 0)),    # b2: resident
        ],
        out_specs=pl.BlockSpec((tb, Q), lambda i: (i, 0)),
        compiler_params=pltpu.CompilerParams(
            # batch tiles are independent -> megacore sharding on v7x
            dimension_semantics=("parallel",),
            vmem_limit_bytes=_vmem_limit_bytes(tb, Q, K, x.dtype, w1.dtype, out_dtype),
        ),
        cost_estimate=cost,
    )(x, w1, b1, w2, b2)


def reference_forward(x, w1, b1, w2, b2):
    h = jax.nn.sigmoid(jnp.dot(x, w1, precision="highest") + b1)
    return jax.nn.sigmoid(jnp.dot(h, w2, precision="highest") + b2)


if __name__ == "__main__":
    # Small shapes consistent with the module's forward (num_question=256, k=128).
    # B=200 is deliberately not a multiple of the chosen tile so the no-pad
    # partial-tail path is exercised (tb=56 -> grid=4, tail block of 32 rows).
    B, Q, K = 200, 256, 128

    key = jax.random.PRNGKey(0)
    kx, kw1, kb1, kw2, kb2 = jax.random.split(key, 5)

    x = jax.random.normal(kx, (B, Q), dtype=jnp.float32)

    # Deterministic init mimicking nn.Linear's uniform(-1/sqrt(fan_in), +).
    lim1 = 1.0 / jnp.sqrt(jnp.float32(Q))
    lim2 = 1.0 / jnp.sqrt(jnp.float32(K))
    w1 = jax.random.uniform(kw1, (Q, K), jnp.float32, -lim1, lim1)   # g.weight.T
    b1 = jax.random.uniform(kb1, (1, K), jnp.float32, -lim1, lim1)   # g.bias
    w2 = jax.random.uniform(kw2, (K, Q), jnp.float32, -lim2, lim2)   # h.weight.T
    b2 = jax.random.uniform(kb2, (1, Q), jnp.float32, -lim2, lim2)   # h.bias

    ref = reference_forward(x, w1, b1, w2, b2)

    fwd = jax.jit(functools.partial(autoencoder_forward))

    # --- f32 path (exact sigmoid; slack only for MXU matmul precision) ---
    out = jax.block_until_ready(fwd(x, w1, b1, w2, b2))
    assert out.shape == (B, Q) and out.dtype == x.dtype
    assert jnp.allclose(out, ref, atol=2e-3), float(jnp.max(jnp.abs(out - ref)))

    # --- bf16 activations + weights (intended default: halves HBM traffic,
    #     native bf16 MXU rate; f32 accumulation and f32 biases kept) ---
    x_bf16 = x.astype(jnp.bfloat16)
    out_bf16 = jax.block_until_ready(
        fwd(x_bf16, w1.astype(jnp.bfloat16), b1, w2.astype(jnp.bfloat16), b2))
    assert out_bf16.shape == (B, Q) and out_bf16.dtype == jnp.bfloat16
    assert jnp.allclose(out_bf16.astype(jnp.float32), ref, atol=3e-2), \
        float(jnp.max(jnp.abs(out_bf16.astype(jnp.float32) - ref)))

    # TODO(synk): get_weight_norm() is a training-time utility (plain norm), not
    # part of the forward pass; intentionally not ported to a kernel.
    print("KERNEL_OK")
</pallas_src>

<mosaic_0001>
module attributes {stable_mosaic.version = 11 : i64} {
  func.func @autoencoder_kernel(%arg0: i32, %arg1: memref<56x256xf32, #tpu.memory_space<vmem>>, %arg2: memref<256x128xf32, #tpu.memory_space<vmem>>, %arg3: memref<1x128xf32, #tpu.memory_space<vmem>>, %arg4: memref<128x256xf32, #tpu.memory_space<vmem>>, %arg5: memref<1x256xf32, #tpu.memory_space<vmem>>, %arg6: memref<56x256xf32, #tpu.memory_space<vmem>>) attributes {dimension_semantics = [#tpu.dimension_semantics<parallel>], iteration_bounds = array<i64: 4>, scalar_prefetch = 0 : i64, scratch_operands = 0 : i64, tpu.core_type = #tpu.core_type<tc>, window_params = [{transform_indices = @transform_0, window_bounds = array<i64: 56, 256>}, {pipeline_mode = #tpu.pipeline_mode<synchronous>, transform_indices = @transform_1, window_bounds = array<i64: 256, 128>}, {pipeline_mode = #tpu.pipeline_mode<synchronous>, transform_indices = @transform_2, window_bounds = array<i64: 1, 128>}, {pipeline_mode = #tpu.pipeline_mode<synchronous>, transform_indices = @transform_3, window_bounds = array<i64: 128, 256>}, {pipeline_mode = #tpu.pipeline_mode<synchronous>, transform_indices = @transform_4, window_bounds = array<i64: 1, 256>}, {transform_indices = @transform_5, window_bounds = array<i64: 56, 256>}]} {
    %c0 = arith.constant 0 : index
    %c0_0 = arith.constant 0 : index
    %0 = vector.load %arg1[%c0, %c0_0] : memref<56x256xf32, #tpu.memory_space<vmem>>, vector<56x256xf32>
    %c0_1 = arith.constant 0 : index
    %c0_2 = arith.constant 0 : index
    %1 = vector.load %arg2[%c0_1, %c0_2] : memref<256x128xf32, #tpu.memory_space<vmem>>, vector<256x128xf32>
    %cst = arith.constant dense<0.000000e+00> : vector<56x128xf32>
    %2 = tpu.matmul %0, %1, %cst {dimension_numbers = #tpu.dot_dimension_numbers<[1], [0], [0], [1], [0, 0, 1, 1], [], []>} : vector<56x256xf32>, vector<256x128xf32>, vector<56x128xf32> -> vector<56x128xf32>
    %c0_3 = arith.constant 0 : index
    %c0_4 = arith.constant 0 : index
    %3 = vector.load %arg3[%c0_3, %c0_4] : memref<1x128xf32, #tpu.memory_space<vmem>>, vector<1x128xf32>
    %4 = vector.broadcast %3 : vector<1x128xf32> to vector<56x128xf32>
    %5 = arith.addf %2, %4 : vector<56x128xf32>
    %cst_5 = arith.constant 5.000000e-01 : f32
    %6 = vector.broadcast %cst_5 : f32 to vector<56x128xf32>
    %7 = arith.mulf %6, %5 : vector<56x128xf32>
    %8 = math.tanh %7 : vector<56x128xf32>
    %cst_6 = arith.constant 5.000000e-01 : f32
    %9 = vector.broadcast %cst_6 : f32 to vector<56x128xf32>
    %10 = arith.mulf %9, %8 : vector<56x128xf32>
    %cst_7 = arith.constant 5.000000e-01 : f32
    %11 = vector.broadcast %cst_7 : f32 to vector<56x128xf32>
    %12 = arith.addf %10, %11 : vector<56x128xf32>
    %c0_8 = arith.constant 0 : index
    %c0_9 = arith.constant 0 : index
    %13 = vector.load %arg4[%c0_8, %c0_9] : memref<128x256xf32, #tpu.memory_space<vmem>>, vector<128x256xf32>
    %cst_10 = arith.constant dense<0.000000e+00> : vector<56x256xf32>
    %14 = tpu.matmul %12, %13, %cst_10 {dimension_numbers = #tpu.dot_dimension_numbers<[1], [0], [0], [1], [0, 0, 1, 1], [], []>} : vector<56x128xf32>, vector<128x256xf32>, vector<56x256xf32> -> vector<56x256xf32>
    %c0_11 = arith.constant 0 : index
    %c0_12 = arith.constant 0 : index
    %15 = vector.load %arg5[%c0_11, %c0_12] : memref<1x256xf32, #tpu.memory_space<vmem>>, vector<1x256xf32>
    %16 = vector.broadcast %15 : vector<1x256xf32> to vector<56x256xf32>
    %17 = arith.addf %14, %16 : vector<56x256xf32>
    %cst_13 = arith.constant 5.000000e-01 : f32
    %18 = vector.broadcast %cst_13 : f32 to vector<56x256xf32>
    %19 = arith.mulf %18, %17 : vector<56x256xf32>
    %20 = math.tanh %19 : vector<56x256xf32>
    %cst_14 = arith.constant 5.000000e-01 : f32
    %21 = vector.broadcast %cst_14 : f32 to vector<56x256xf32>
    %22 = arith.mulf %21, %20 : vector<56x256xf32>
    %cst_15 = arith.constant 5.000000e-01 : f32
    %23 = vector.broadcast %cst_15 : f32 to vector<56x256xf32>
    %24 = arith.addf %22, %23 : vector<56x256xf32>
    %c0_16 = arith.constant 0 : index
    %c0_17 = arith.constant 0 : index
    %25 = vector.load %arg6[%c0_16, %c0_17] : memref<56x256xf32, #tpu.memory_space<vmem>>, vector<56x256xf32>
    tpu.vector_store %arg6[%c0_16, %c0_17], %24 {strides = array<i32>} : memref<56x256xf32, #tpu.memory_space<vmem>>, vector<56x256xf32>,
    return
  }
  func.func @transform_0(%arg0: i32) -> (i32, i32) {
    %c0_i32 = arith.constant 0 : i32
    %c0_i32_0 = arith.constant 0 : i32
    return %arg0, %c0_i32 : i32, i32
  }
  func.func @transform_1(%arg0: i32) -> (i32, i32) {
    %c0_i32 = arith.constant 0 : i32
    %c0_i32_0 = arith.constant 0 : i32
    %c0_i32_1 = arith.constant 0 : i32
    return %c0_i32, %c0_i32_0 : i32, i32
  }
  func.func @transform_2(%arg0: i32) -> (i32, i32) {
    %c0_i32 = arith.constant 0 : i32
    %c0_i32_0 = arith.constant 0 : i32
    %c0_i32_1 = arith.constant 0 : i32
    return %c0_i32, %c0_i32_0 : i32, i32
  }
  func.func @transform_3(%arg0: i32) -> (i32, i32) {
    %c0_i32 = arith.constant 0 : i32
    %c0_i32_0 = arith.constant 0 : i32
    %c0_i32_1 = arith.constant 0 : i32
    return %c0_i32, %c0_i32_0 : i32, i32
  }
  func.func @transform_4(%arg0: i32) -> (i32, i32) {
    %c0_i32 = arith.constant 0 : i32
    %c0_i32_0 = arith.constant 0 : i32
    %c0_i32_1 = arith.constant 0 : i32
    return %c0_i32, %c0_i32_0 : i32, i32
  }
  func.func @transform_5(%arg0: i32) -> (i32, i32) {
    %c0_i32 = arith.constant 0 : i32
    %c0_i32_0 = arith.constant 0 : i32
    return %arg0, %c0_i32 : i32, i32
  }
}

</mosaic_0001>

<bundles_post_ra>
// kernel: autoencoder_forward.1
= control target key start
LH: loop header
LB: loop body
LE: loop exit
PB: predicated region body
PF: predicated region fallthrough
CT: control target
= control target key end

     0   :  { %10 = vsyncpa [#allocation3], 0  ;;  %s1580_s0 = inlined_call_operand.hbm [shape: f32[200,256], index: 0, kind: input, shape index: {}]   ;;  %s1581_s1 = inlined_call_operand.hbm [shape: f32[256,128], index: 1, kind: input, shape index: {}]   ;;  %s1582_s2 = inlined_call_operand.vmem [shape: f32[1,128], index: 2, kind: input, shape index: {}]   ;;  %s1583_s3 = inlined_call_operand.hbm [shape: f32[128,256], index: 3, kind: input, shape index: {}]   ;;  %s1584_s4 = inlined_call_operand.vmem [shape: f32[1,256], index: 4, kind: input, shape index: {}]   ;;  %s1585_s5 = inlined_call_operand.hbm [shape: f32[200,256], index: 5, kind: output, shape index: {}]  }
   0x1   :  { %12 = vsyncpa [#allocation3 + $0x1], 0 }
   0x2   :  { %13 = vsyncpa [#allocation6], 0 }
   0x3   :  { %14 = vsyncpa [#allocation4], 0 }
   0x4   :  { %16 = vsyncpa [#allocation4 + $0x1], 0  ;;  %s1270_s18 = smov 0   ;;  %s1272_s19 = smov 0  }
   0x5   :  { %s1274_s20 = smov 0   ;;  %s1276_s21 = smov 0  }
   0x6 LB: > { %s1291_s22 = sadd.s32 4294967295, %s1225_s21   ;;  %s808_s23 = sadd.s32 4294967294, %s1225_s21   ;;  %s1225_s21 = sphi %s1276_s21, %s1607_s21   ;;  %s1221_s20 = sphi %s1274_s20, %s1606_s20   ;;  %s1217_s19 = sphi %s1272_s19, %s1605_s19   ;;  %s1213_s18 = sphi %s1270_s18, %s1604_s18  }
   0x7   : > { %s1295_s24 = sadd.s32 1, %s1225_s21   ;;  %s29_s25 = sadd.s32 1, %s1221_s20 }
   0x8   : > { %s26_s26 = ssub.s32 %s1225_s21, %s1295_s24  ;;  %p36_p0 = scmp.ne.s32.totalorder %s1221_s20, %s1217_s19 }
   0x9   : > { %p27_p1 = scmp.eq.s32.totalorder %s26_s26, 0  ;;  %p37_p2 = scmp.eq.s32.totalorder %s1225_s21, 0 }
   0xa   : > { %p42_p3 = scmp.ne.s32.totalorder %s1217_s19, %s1213_s18  ;;  %p1586_p4 = scmp.eq.s32.totalorder %s1291_s22, 0 }
   0xb   : > { %s1307_s27 = scalar_select %p27_p1, %s1221_s20, %s29_s25  }
   0xc   : > { %p1309_p5 = por %p37_p2, %p36_p0  ;;  %p1315_p6 = por %p1586_p4, %p42_p3 }
   0xd   : > { %1589 = sst [smem:[#allocation12_spill]] %s1307_s27  ;;  %p150_p7 = scmp.eq.s32.totalorder %s1291_s22, 3 }
   0xe   : > { %s1590_s28 = scalar_select %p1309_p5, 1, 0 }
   0xf   : > { %s1591_s29 = scalar_select %p1315_p6, 1, 0 }
  0x10   : > { %p156_p8 = scmp.eq.s32.totalorder %s808_s23, 3  ;;  %p809_p9 = scmp.ge.s32.totalorder %s1225_s21, 1 }
  0x11   : > { %p163_p10 = scmp.lt.s32.totalorder %s1225_s21, 5  ;;  %p1322_p11 = por %p150_p7, %p36_p0 }
  0x12   : > { %p1326_p12 = por %p156_p8, %p42_p3  ;;  %s1227_s8 = smov [#allocation5]  }
  0x13   : > { %s1592_s30 = scalar_select %p1322_p11, 1, 0 }
  0x14   : > { %s1593_s6 = scalar_select %p1326_p12, 1, 0 }
  0x15   : > { %p1330_p13 = pnand %p809_p9, %p163_p10  ;;  %s175_s9 = sshll.u32 %s1227_s8, 4  ;;  %s176_s9 = int_to_ptr.vmem [resolvable:$true] %s175_s9 }
  0x16   : > { %s1228_s11 = smov [#allocation7]   ;;  %s1071_s15 = scalar_lea.hbm %s1581_s1, 4096 }
  0x17   : > { %s1594_s7 = scalar_select %p1330_p13, 1, 0 }
  0x18   : > { %p970_p1 = pneg %p1330_p13  ;;  %s191_s12 = sshll.u32 %s1228_s11, 4  ;;  %s1342_s12 = int_to_ptr.vmem [resolvable:$true] %s191_s12 }
  0x19   : > { %p1072_p0 = scmp.ne.s32.totalorder %s1581_s1, %s1071_s15  ;;  %p1078_p9 = scmp.lt.u32.totalorder %s1071_s15, %s1581_s1 }
  0x1a   : > { %p1338_p2 = pnand %p970_p1, %p1586_p4 }
  0x1c   : > { %p1073_p3 = pneg %p1338_p2 }
  0x1e   : > { %p1074_p7 = pnand %p1073_p3, %p1072_p0 }
  0x20   : > { %p1075_p8 = pneg %p1074_p7 }
  0x22   : > { %p1080_p10 = pnand %p1078_p9, %p1075_p8 }
  0x24   : > { %1083 = shalt.err (!%p1080_p10)
}
  0x25   : > { %s1084_s26 = scalar_lea.vmem %s176_s9, 4096  ;;  %p1092_p11 = scmp.lt.s32.totalorder %s176_s9, %s176_s9 }
  0x26   : > { %p1085_p1 = scmp.ne.s32.totalorder %s176_s9, %s1084_s26  ;;  %p1093_p6 = scmp.lt.s32.totalorder %s1084_s26, %s1084_s26 }
  0x28   : > { %p1087_p4 = pnand %p1085_p1, %p1073_p3  ;;  %p1094_p13 = por %p1093_p6, %p1092_p11 }
  0x2a   : > { %p1088_p12 = pneg %p1087_p4 }
  0x2c   : > { %p1095_p5 = pnand %p1094_p13, %p1088_p12 }
  0x2e   : > { %1098 = shalt.err (!%p1095_p5)
}
  0x2f   : > { %s1229_s8 = smov 128   ;;  %s1230_s11 = smov 8  }
  0x30   : > { %973 = dma.hbm_to_vmem [thread:$0]  (!%p1338_p2), %s1581_s1, 4096, %s176_s9, [#allocation6], %s1229_s8, %s1229_s8, %s1230_s11  }
  0x31   : > { %s1099_s17 = scalar_lea.hbm %s1583_s3, 4096 }
  0x32   : > { %p1100_p4 = scmp.ne.s32.totalorder %s1583_s3, %s1099_s17  ;;  %p1106_p11 = scmp.lt.u32.totalorder %s1099_s17, %s1583_s3 }
  0x34   : > { %p1102_p5 = pnand %p1100_p4, %p1073_p3 }
  0x36   : > { %p1103_p6 = pneg %p1102_p5 }
  0x38   : > { %p1108_p12 = pnand %p1106_p11, %p1103_p6 }
  0x3a   : > { %1111 = shalt.err (!%p1108_p12)
}
  0x3b   : > { %s1112_s9 = scalar_lea.vmem %s1342_s12, 4096  ;;  %p1120_p8 = scmp.lt.s32.totalorder %s1342_s12, %s1342_s12 }
  0x3c   : > { %p1113_p13 = scmp.ne.s32.totalorder %s1342_s12, %s1112_s9  ;;  %p1121_p9 = scmp.lt.s32.totalorder %s1112_s9, %s1112_s9 }
  0x3e   : > { %p1115_p0 = pnand %p1113_p13, %p1073_p3  ;;  %p1122_p10 = por %p1121_p9, %p1120_p8 }
  0x40   : > { %p1116_p7 = pneg %p1115_p0 }
  0x42   : > { %p1123_p1 = pnand %p1122_p10, %p1116_p7 }
  0x44   : > { %1126 = shalt.err (!%p1123_p1)
}
  0x45   : > { %s1231_s27 = smov 256   ;;  %s1232_s8 = smov 16  }
  0x46   : > { %976 = dma.hbm_to_vmem [thread:$0]  (!%p1338_p2), %s1583_s3, 4096, %s1342_s12, [#allocation6], %s1231_s27, %s1231_s27, %s1232_s8  }
  0x47   : > { %p812_p4 = scmp.ge.s32.totalorder %s1225_s21, 4 }
  0x48   : > { %p1596_p3 = scmp.ne.s32.totalorder (!%p812_p4), %s1590_s28, 0 }
  0x49   : > { %204 = sbr.rel (%p812_p4) target bundleno = 115 (0x73), region = 32 }
  0x50   : > { %207 = sbr.rel (!%p1596_p3) target bundleno = 115 (0x73), region = 36  ;;  %s208_s14 = sand.u32 (%p1596_p3), 1, %s1221_s20  }
  0x51   : > { %s213_s15 = smul.u32 (%p1596_p3), 7, %s1225_s21  ;;  %s1399_s25 = scalar_lea.sflag (%p1596_p3), [#allocation3], %s208_s14 }
  0x52   : > { %s958_s16 = smul.u32 (%p1596_p3), 112, %s208_s14 }
  0x53   : > { %s214_s17 = ssub.s32 (%p1596_p3), 25, %s213_s15 }
  0x54   : > { %p215_p5 = scmp.lt.s32.totalorder (%p1596_p3), %s214_s17, 7  ;;  %s212_s12 = scalar_lea.vmem (%p1596_p3), [#allocation2], %s958_s16 }
  0x57   : > { %s1609_s17 = smov (!%p215_p5, %s214_s17), 7 }
  0x58   : > { %s1396_s23 = sshll.u32 %s1609_s17, 8 }
  0x59   : > { %s220_s10 = ssub.s32 1792, %s1396_s23 }
  0x5a   : > { %221 = vsyncadd %s1399_s25, %s220_s10  ;;  %p815_p2 = scmp.ne.s32.totalorder %s1396_s23, 0  ;;  %s839_s28 = smul.u32 1792, %s1225_s21 }
  0x5b   : > { %s227_s26 = sshll.u32 %s212_s12, 4  ;;  %s1131_s15 = scalar_lea.hbm %s1580_s0, 6400  ;;  %s1409_s26 = int_to_ptr.vmem [resolvable:$true] %s227_s26 }
  0x5c   : > { %s1407_s8 = scalar_lea.hbm %s1580_s0, %s839_s28 }
  0x5d   : > { %s1127_s11 = scalar_lea.hbm %s1407_s8, %s1396_s23  ;;  %p1132_p13 = scmp.lt.u32.totalorder %s1407_s8, %s1580_s0 }
  0x5e   : > { %p1128_p6 = scmp.ne.s32.totalorder %s1407_s8, %s1127_s11  ;;  %p1133_p0 = scmp.lt.u32.totalorder %s1131_s15, %s1127_s11 }
  0x5f   : > { %p1135_p8 = scmp.lt.u32.totalorder %s1127_s11, %s1407_s8 }
  0x60   : > { %p1129_p11 = pnand %p1128_p6, %p815_p2  ;;  %p1134_p7 = por %p1133_p0, %p1132_p13 }
  0x62   : > { %p1130_p12 = pneg %p1129_p11  ;;  %p1136_p9 = por %p1135_p8, %p1134_p7 }
  0x64   : > { %p1137_p10 = pnand %p1136_p9, %p1130_p12 }
  0x66   : > { %1140 = shalt.err (!%p1137_p10)
}
  0x67   : > { %s1141_s10 = scalar_lea.vmem %s1409_s26, %s1396_s23  ;;  %s1233_s12 = smov [#allocation2]  }
  0x68   : > { %p1142_p1 = scmp.ne.s32.totalorder %s1409_s26, %s1141_s10  ;;  %s1145_s28 = sshll.u32 %s1233_s12, 4  ;;  %s1146_s28 = int_to_ptr.vmem [resolvable:$false] %s1145_s28 }
  0x69   : > { %s1147_s9 = scalar_lea.vmem %s1146_s28, 3584  ;;  %p1148_p5 = scmp.lt.s32.totalorder %s1409_s26, %s1146_s28 }
  0x6a   : > { %p1143_p4 = pnand %p1142_p1, %p815_p2  ;;  %p1149_p6 = scmp.lt.s32.totalorder %s1147_s9, %s1141_s10 }
  0x6c   : > { %p1144_p3 = pneg %p1143_p4  ;;  %p1150_p11 = por %p1149_p6, %p1148_p5 }
  0x6e   : > { %p1151_p13 = pnand %p1150_p11, %p1144_p3 }
  0x70   : > { %1154 = shalt.err (!%p1151_p13)
}
  0x71   : > { %s1234_s27 = smov 256   ;;  %s1235_s11 = smov 16  }
  0x72   : > { %233 = dma.hbm_to_vmem [thread:$0]  (%p815_p2), %s1407_s8, %s1396_s23, %s1409_s26, %s1399_s25, %s1234_s27, %s1234_s27, %s1235_s11  }
  0x73 PF: > { %p1597_p12 = scmp.ne.s32.totalorder %s1594_s7, 0 }
  0x74   : > { %s1439_s13 = sand.u32 (!%p1597_p12), 1, %s1217_s19   ;;  %p1598_p0 = scmp.ne.s32.totalorder (!%p1597_p12), %s1591_s29, 0 }
  0x75   : > { %239 = sbr.rel (%p1597_p12) target bundleno = 682 (0x2aa), region = 40  ;;  %s242_s15 = scalar_lea.sflag (!%p1597_p12), [#allocation3], %s1439_s13 }
  0x76   : > { %s959_s14 = smul.u32 (!%p1597_p12), 112, %s1439_s13 }
  0x78   : > { %s1445_s16 = scalar_lea.vmem (!%p1597_p12), [#allocation2], %s959_s14 }
  0x7c   : > { %1200 = dma.done.wait (%p1598_p0), %s242_s15, 1792  }
  0x7d   : > { %1202 = vsyncadd (%p1598_p0), %s242_s15, 4294965504  ;;  %p1599_p2 = scmp.eq.s32.totalorder %s1291_s22, 0 }
  0x7f   : > { %1204 = dma.done.wait (%p1599_p2), [#allocation6], 8192   ;;  %p1600_p7 = pmov %p1599_p2 }
  0x80   : > { %v322_v0 = vld [vmem:[#allocation5 + $0x80] sm:$0xff]  ;;  %v323_v1 = vld [vmem:[#allocation5 + $0x88] sm:$0xff]  ;;  %v324_v5 = vld [vmem:[#allocation5 + $0x90] sm:$0xff]  ;;  %s1498_s26 = scalar_lea.vmem [#allocation8], %s959_s14  ;;  %s695_s8 = scalar_lea.sflag [#allocation4], %s1439_s13 }
  0x81   : > { %1206 = vsyncadd (%p1600_p7), [#allocation6], 4294959104  ;;  %v306_v2 = vld [vmem:[#allocation5] sm:$0xff]  ;;  %v894_v3 = vpack.c.bf16 %v323_v1, %v322_v0  ;;  %v307_v4 = vld [vmem:[#allocation5 + $0x8] sm:$0xff]  ;;  %p1601_p8 = scmp.ne.s32.totalorder %s1592_s30, 0 }
  0x82   : > { %v325_v6 = vld [vmem:[#allocation5 + $0x98] sm:$0xff]  ;;  %v896_v7 = vpack.c.bf16 %v307_v4, %v306_v2  ;;  %v308_v9 = vld [vmem:[#allocation5 + $0x10] sm:$0xff]  ;;  %v326_v11 = vld [vmem:[#allocation5 + $0xa0] sm:$0xff]  ;;  %s702_s17 = smul.u32 (%p1601_p8), 7, %s1291_s22 }
  0x83   : > { %v898_v8 = vpack.c.bf16 %v325_v6, %v324_v5  ;;  %v309_v10 = vld [vmem:[#allocation5 + $0x18] sm:$0xff]  ;;  %895 = vmatprep.subr.bf16.mxu0 %v894_v3  ;;  %v327_v12 = vld [vmem:[#allocation5 + $0xa8] sm:$0xff]  ;;  %v310_v15 = vld [vmem:[#allocation5 + $0x20] sm:$0xff] }
  0x84   : > { %897 = vmatpush3.bf16.msra.mxu0 %v896_v7  ;;  %v900_v13 = vpack.c.bf16 %v309_v10, %v308_v9  ;;  %v902_v14 = vpack.c.bf16 %v327_v12, %v326_v11  ;;  %v311_v16 = vld [vmem:[#allocation5 + $0x28] sm:$0xff]  ;;  %v328_v17 = vld [vmem:[#allocation5 + $0xb0] sm:$0xff]  ;;  %v329_v18 = vld [vmem:[#allocation5 + $0xb8] sm:$0xff]  ;;  %s703_s10 = ssub.s32 (%p1601_p8), 25, %s702_s17 }
  0x85   : > { %899 = vmatprep.subr.bf16.mxu0 %v898_v8  ;;  %v904_v19 = vpack.c.bf16 %v311_v16, %v310_v15  ;;  %v906_v20 = vpack.c.bf16 %v329_v18, %v328_v17  ;;  %v312_v21 = vld [vmem:[#allocation5 + $0x30] sm:$0xff]  ;;  %v313_v22 = vld [vmem:[#allocation5 + $0x38] sm:$0xff]  ;;  %v330_v23 = vld [vmem:[#allocation5 + $0xc0] sm:$0xff]  ;;  %p704_p9 = scmp.lt.s32.totalorder (%p1601_p8), %s703_s10, 7 }
  0x86   : > { %v331_v24 = vld [vmem:[#allocation5 + $0xc8] sm:$0xff]  ;;  %v908_v26 = vpack.c.bf16 %v313_v22, %v312_v21  ;;  %v314_v28 = vld [vmem:[#allocation5 + $0x40] sm:$0xff]  ;;  %v332_v30 = vld [vmem:[#allocation5 + $0xd0] sm:$0xff] }
  0x87   : > { %v293_v25 = vld [vmem:[%s1445_s16 + $0x8] sm:$0xff]  ;;  %v910_v27 = vpack.c.bf16 %v331_v24, %v330_v23  ;;  %v316_v32 = vld [vmem:[#allocation5 + $0x50] sm:$0xff]  ;;  %v334_v37 = vld [vmem:[#allocation5 + $0xe0] sm:$0xff] }
  0x88   : > { %901 = vmatpush3.bf16.msra.mxu0 %v900_v13  ;;  %409 = vmatprep.mubr.f32.mxu0 %v293_v25  ;;  %v315_v29 = vld [vmem:[#allocation5 + $0x48] sm:$0xff]  ;;  %v333_v31 = vld [vmem:[#allocation5 + $0xd8] sm:$0xff]  ;;  %v473_v39 = vld [vmem:[#allocation7] sm:$0xff] }
  0x89   : > { %903 = vmatprep.subr.bf16.mxu0 %v902_v14  ;;  %v317_v33 = vld [vmem:[#allocation5 + $0x58] sm:$0xff]  ;;  %v474_v34 = vld [vmem:[#allocation7 + $0x8] sm:$0xff]  ;;  %v912_v36 = vpack.c.bf16 %v315_v29, %v314_v28  ;;  %v475_v40 = vld [vmem:[#allocation7 + $0x10] sm:$0xff]  ;;  %v914_v42 = vpack.c.bf16 %v333_v31, %v332_v30 }
  0x8a   : > { %v476_v35 = vld [vmem:[#allocation7 + $0x18] sm:$0xff]  ;;  %v478_v41 = vld [vmem:[#allocation7 + $0x28] sm:$0xff]  ;;  %v928_v43 = vpack.c.bf16 %v475_v40, %v473_v39  ;;  %v477_v45 = vld [vmem:[#allocation7 + $0x20] sm:$0xff]  ;;  %v916_v52 = vpack.c.bf16 %v317_v33, %v316_v32 }
  0x8b   : > { %v926_v38 = vpack.c.bf16 %v476_v35, %v474_v34  ;;  %v480_v44 = vld [vmem:[#allocation7 + $0x38] sm:$0xff]  ;;  %v479_v46 = vld [vmem:[#allocation7 + $0x30] sm:$0xff]  ;;  %v335_v47 = vld [vmem:[#allocation5 + $0xe8] sm:$0xff] }
  0x8c   : > { %905 = vmatpush3.bf16.msra.mxu0 %v904_v19  ;;  %v930_v48 = vpack.c.bf16 %v480_v44, %v478_v41  ;;  %v482_v49 = vld [vmem:[#allocation7 + $0x48] sm:$0xff]  ;;  %v484_v50 = vld [vmem:[#allocation7 + $0x58] sm:$0xff]  ;;  %v932_v51 = vpack.c.bf16 %v479_v46, %v477_v45  ;;  %v918_v54 = vpack.c.bf16 %v335_v47, %v334_v37  ;;  %v318_v55 = vld [vmem:[#allocation5 + $0x60] sm:$0xff]  ;;  %v1236_v46 = vmov 0.0  }
  0x8d   : > { %907 = vmatprep.subr.bf16.mxu0 %v906_v20  ;;  %927 = vmatprep.subr.bf16.mxu1 %v926_v38  ;;  %v934_v53 = vpack.c.bf16 %v484_v50, %v482_v49  ;;  %v319_v56 = vld [vmem:[#allocation5 + $0x68] sm:$0xff]  ;;  %v336_v57 = vld [vmem:[#allocation5 + $0xf0] sm:$0xff]  ;;  %v337_v58 = vld [vmem:[#allocation5 + $0xf8] sm:$0xff] }
  0x8e   : > { %929 = vmatpush1.bf16.msra.mxu1 %v928_v43  ;;  %v920_v59 = vpack.c.bf16 %v319_v56, %v318_v55  ;;  %v922_v60 = vpack.c.bf16 %v337_v58, %v336_v57  ;;  %v320_v61 = vld [vmem:[#allocation5 + $0x70] sm:$0xff]  ;;  %v321_v62 = vld [vmem:[#allocation5 + $0x78] sm:$0xff]  ;;  %v481_v13 = vld [vmem:[#allocation7 + $0x40] sm:$0xff]  ;;  %581 = vmatprep.mubr.f32.mxu1 %v1236_v46 }
  0x8f   : > { %931 = vmatprep.subr.bf16.mxu1 %v930_v48  ;;  %v924_v63 = vpack.c.bf16 %v321_v62, %v320_v61  ;;  %v292_v0 = vld [vmem:[%s1445_s16] sm:$0xff]  ;;  %v295_v1 = vld [vmem:[%s1445_s16 + $0x18] sm:$0xff]  ;;  %v294_v2 = vld [vmem:[%s1445_s16 + $0x10] sm:$0xff] }
  0x90   : > { %909 = vmatpush3.bf16.msra.mxu0 %v908_v26  ;;  %v297_v3 = vld [vmem:[%s1445_s16 + $0x28] sm:$0xff]  ;;  %v296_v4 = vld [vmem:[%s1445_s16 + $0x20] sm:$0xff]  ;;  %v299_v5 = vld [vmem:[%s1445_s16 + $0x38] sm:$0xff] }
  0x91   : > { %911 = vmatprep.subr.bf16.mxu0 %v910_v27  ;;  %v298_v6 = vld [vmem:[%s1445_s16 + $0x30] sm:$0xff]  ;;  %v301_v7 = vld [vmem:[%s1445_s16 + $0x48] sm:$0xff]  ;;  %v300_v8 = vld [vmem:[%s1445_s16 + $0x40] sm:$0xff] }
  0x92   : > { %933 = vmatpush1.bf16.msra.mxu1 %v932_v51  ;;  %v303_v9 = vld [vmem:[%s1445_s16 + $0x58] sm:$0xff]  ;;  %v302_v10 = vld [vmem:[%s1445_s16 + $0x50] sm:$0xff]  ;;  %v305_v11 = vld [vmem:[%s1445_s16 + $0x68] sm:$0xff] }
  0x93   : > { %935 = vmatprep.subr.bf16.mxu1 %v934_v53  ;;  %v304_v12 = vld [vmem:[%s1445_s16 + $0x60] sm:$0xff]  ;;  %v486_v16 = vld [vmem:[#allocation7 + $0x68] sm:$0xff]  ;;  %v488_v17 = vld [vmem:[#allocation7 + $0x78] sm:$0xff] }
  0x94   : > { %913 = vmatpush3.bf16.msra.mxu0 %v912_v36  ;;  %v483_v14 = vld [vmem:[#allocation7 + $0x50] sm:$0xff]  ;;  %v938_v18 = vpack.c.bf16 %v488_v17, %v486_v16  ;;  %v485_v19 = vld [vmem:[#allocation7 + $0x60] sm:$0xff]  ;;  %v490_v22 = vld [vmem:[#allocation7 + $0x88] sm:$0xff] }
  0x95   : > { %915 = vmatprep.subr.bf16.mxu0 %v914_v42  ;;  %v936_v15 = vpack.c.bf16 %v483_v14, %v481_v13  ;;  %v487_v20 = vld [vmem:[#allocation7 + $0x70] sm:$0xff]  ;;  %v492_v23 = vld [vmem:[#allocation7 + $0x98] sm:$0xff]  ;;  %v489_v25 = vld [vmem:[#allocation7 + $0x80] sm:$0xff] }
  0x96   : > { %v940_v21 = vpack.c.bf16 %v487_v20, %v485_v19  ;;  %v942_v24 = vpack.c.bf16 %v492_v23, %v490_v22  ;;  %v491_v26 = vld [vmem:[#allocation7 + $0x90] sm:$0xff]  ;;  %v494_v28 = vld [vmem:[#allocation7 + $0xa8] sm:$0xff]  ;;  %v496_v29 = vld [vmem:[#allocation7 + $0xb8] sm:$0xff] }
  0x97   : > { %937 = vmatpush1.bf16.msra.mxu1 %v936_v15  ;;  %v944_v27 = vpack.c.bf16 %v491_v26, %v489_v25  ;;  %v946_v30 = vpack.c.bf16 %v496_v29, %v494_v28  ;;  %v493_v31 = vld [vmem:[#allocation7 + $0xa0] sm:$0xff]  ;;  %v495_v32 = vld [vmem:[#allocation7 + $0xb0] sm:$0xff]  ;;  %v498_v34 = vld [vmem:[#allocation7 + $0xc8] sm:$0xff] }
  0x98   : > { %917 = vmatpush3.bf16.msra.mxu0 %v916_v52  ;;  %939 = vmatprep.subr.bf16.mxu1 %v938_v18  ;;  %v948_v33 = vpack.c.bf16 %v495_v32, %v493_v31  ;;  %v500_v35 = vld [vmem:[#allocation7 + $0xd8] sm:$0xff]  ;;  %v497_v37 = vld [vmem:[#allocation7 + $0xc0] sm:$0xff]  ;;  %v499_v38 = vld [vmem:[#allocation7 + $0xd0] sm:$0xff] }
  0x99   : > { %919 = vmatprep.subr.bf16.mxu0 %v918_v54  ;;  %v950_v36 = vpack.c.bf16 %v500_v35, %v498_v34  ;;  %v952_v39 = vpack.c.bf16 %v499_v38, %v497_v37  ;;  %v502_v40 = vld [vmem:[#allocation7 + $0xe8] sm:$0xff]  ;;  %v504_v41 = vld [vmem:[#allocation7 + $0xf8] sm:$0xff]  ;;  %v501_v43 = vld [vmem:[#allocation7 + $0xe0] sm:$0xff] }
  0x9a   : > { %v954_v42 = vpack.c.bf16 %v504_v41, %v502_v40  ;;  %v503_v44 = vld [vmem:[#allocation7 + $0xf0] sm:$0xff]  ;;  %v823_v48 = vld [vmem:[%s1582_s2] ss:$0 sm:$0xff]  ;;  %v507_v40 = vlaneseq }
  0x9b   : > { %941 = vmatpush1.bf16.msra.mxu1 %v940_v21  ;;  %v956_v45 = vpack.c.bf16 %v503_v44, %v501_v43  ;;  %v505_v43 = vld [vmem:[%s1584_s4] sm:$0x3] }
  0x9c   : > { %921 = vmatpush3.bf16.msra.mxu0 %v920_v59  ;;  %943 = vmatprep.subr.bf16.mxu1 %v942_v24  ;;  %v508_v41 = vshrl.u32 %v507_v40, 7 }
  0x9d   : > { %923 = vmatprep.subr.bf16.mxu0 %v922_v60 }
  0x9e   : > { %v513_v44 = vsub.s32 1, %v508_v41 }
  0x9f   : > { %945 = vmatpush1.bf16.msra.mxu1 %v944_v27 }
  0xa0   : > { %925 = vmatpush3.bf16.msra.mxu0 %v924_v63  ;;  %947 = vmatprep.subr.bf16.mxu1 %v946_v30 }
  0xa3   : > { %410 = vmatmul.mubr.f32.vlgmr.msra.gmra.mrb[0].mxu0 %v292_v0  ;;  %949 = vmatpush1.bf16.msra.mxu1 %v948_v33 }
  0xa4   : > { %414 = vmatprep.mubr.f32.mxu0 %v295_v1  ;;  %951 = vmatprep.subr.bf16.mxu1 %v950_v36 }
  0xa7   : > { %415 = vmatmul.mubr.f32.gmra.mrb[2].mxu0 %v294_v2  ;;  %953 = vmatpush1.bf16.msra.mxu1 %v952_v39 }
  0xa8   : > { %419 = vmatprep.mubr.f32.mxu0 %v297_v3  ;;  %955 = vmatprep.subr.bf16.mxu1 %v954_v42  ;;  %v509_v42 = vsub.s32 0, %v508_v41 }
  0xab   : > { %420 = vmatmul.mubr.f32.gmra.mrb[4].mxu0 %v296_v4  ;;  %957 = vmatpush1.bf16.msra.mxu1 %v956_v45  ;;  %v1482_v45 = vrot.slane %v505_v43, %v509_v42 }
  0xac   : > { %424 = vmatprep.mubr.f32.mxu0 %v299_v5 }
  0xaf   : > { %425 = vmatmul.mubr.f32.gmra.mrb[6].mxu0 %v298_v6 }
  0xb0   : > { %429 = vmatprep.mubr.f32.mxu0 %v301_v7 }
  0xb3   : > { %430 = vmatmul.mubr.f32.gmra.mrb[8].mxu0 %v300_v8 }
  0xb4   : > { %434 = vmatprep.mubr.f32.mxu0 %v303_v9 }
  0xb7   : > { %435 = vmatmul.mubr.f32.gmra.mrb[10].mxu0 %v302_v10 }
  0xb8   : > { %439 = vmatprep.mubr.f32.mxu0 %v305_v11 }
  0xbb   : > { %440 = vmatmul.mubr.f32.gmra.mrb[12].mxu0 %v304_v12 }
 0x176   : > { %v873_v47 = vpop.f32.mrb[0].mxu0 }
 0x177   : > { %v874_v49 = vpop.f32.mrb[1].mxu0 }
 0x178   : > { %v875_v50 = vadd.f32 %v874_v49, %v873_v47  ;;  %v1484_v47 = vrot.slane %v505_v43, %v513_v44 }
 0x17a   : > { %v412_v51 = vadd.f32 %v875_v50, %v823_v48  ;;  %v876_v52 = vpop.f32.mrb[2].mxu0 }
 0x17b   : > { %v877_v53 = vpop.f32.mrb[3].mxu0 }
 0x17c   : > { %v445_v54 = vmul.f32 0.5, %v412_v51  ;;  %v878_v55 = vadd.f32 %v877_v53, %v876_v52 }
 0x17e   : > { %1029 = vtanh.f32 %v445_v54  ;;  %v417_v56 = vadd.f32 %v878_v55, %v823_v48  ;;  %v879_v57 = vpop.f32.mrb[4].mxu0 }
 0x17f   : > { %v880_v58 = vpop.f32.mrb[5].mxu0 }
 0x180   : > { %v446_v59 = vmul.f32 0.5, %v417_v56  ;;  %v881_v60 = vadd.f32 %v880_v58, %v879_v57 }
 0x182   : > { %1031 = vtanh.f32 %v446_v59  ;;  %v422_v61 = vadd.f32 %v881_v60, %v823_v48  ;;  %v882_v62 = vpop.f32.mrb[6].mxu0 }
 0x183   : > { %v883_v63 = vpop.f32.mrb[7].mxu0 }
 0x184   : > { %v447_v0 = vmul.f32 0.5, %v422_v61  ;;  %v884_v1 = vadd.f32 %v883_v63, %v882_v62 }
 0x186   : > { %1033 = vtanh.f32 %v447_v0  ;;  %v427_v2 = vadd.f32 %v884_v1, %v823_v48  ;;  %v885_v3 = vpop.f32.mrb[8].mxu0 }
 0x187   : > { %v886_v4 = vpop.f32.mrb[9].mxu0 }
 0x188   : > { %v1030_v5 = vpop.eup %1029  ;;  %v448_v6 = vmul.f32 0.5, %v427_v2  ;;  %v887_v7 = vadd.f32 %v886_v4, %v885_v3 }
 0x189   : > { %v459_v8 = vmul.f32 0.5, %v1030_v5 }
 0x18a   : > { %1035 = vtanh.f32 %v448_v6  ;;  %v432_v9 = vadd.f32 %v887_v7, %v823_v48  ;;  %v888_v10 = vpop.f32.mrb[10].mxu0 }
 0x18b   : > { %v889_v11 = vpop.f32.mrb[11].mxu0  ;;  %v466_v12 = vadd.f32 0.5, %v459_v8 }
 0x18c   : > { %v1032_v13 = vpop.eup %1031  ;;  %v449_v14 = vmul.f32 0.5, %v432_v9  ;;  %v890_v15 = vadd.f32 %v889_v11, %v888_v10 }
 0x18d   : > { %582 = vmatmul.mubr.f32.vlgmr.msra.gmra.mrb[0].mxu1 %v466_v12  ;;  %v460_v16 = vmul.f32 0.5, %v1032_v13 }
 0x18e   : > { %1037 = vtanh.f32 %v449_v14  ;;  %v437_v17 = vadd.f32 %v890_v15, %v823_v48  ;;  %v891_v18 = vpop.f32.mrb[12].mxu0  ;;  %587 = vmatprep.mubr.f32.mxu1 %v1236_v46 }
 0x18f   : > { %v892_v19 = vpop.f32.mrb[13].mxu0  ;;  %v467_v20 = vadd.f32 0.5, %v460_v16 }
 0x190   : > { %v1034_v21 = vpop.eup %1033  ;;  %v450_v22 = vmul.f32 0.5, %v437_v17  ;;  %v893_v23 = vadd.f32 %v892_v19, %v891_v18 }
 0x191   : > { %588 = vmatmul.mubr.f32.gmra.mrb[2].mxu1 %v467_v20  ;;  %v461_v24 = vmul.f32 0.5, %v1034_v21 }
 0x192   : > { %1039 = vtanh.f32 %v450_v22  ;;  %v442_v25 = vadd.f32 %v893_v23, %v823_v48  ;;  %593 = vmatprep.mubr.f32.mxu1 %v1236_v46 }
 0x193   : > { %v468_v26 = vadd.f32 0.5, %v461_v24 }
 0x194   : > { %v1036_v27 = vpop.eup %1035  ;;  %v451_v28 = vmul.f32 0.5, %v442_v25 }
 0x195   : > { %594 = vmatmul.mubr.f32.gmra.mrb[4].mxu1 %v468_v26  ;;  %v462_v29 = vmul.f32 0.5, %v1036_v27 }
 0x196   : > { %1041 = vtanh.f32 %v451_v28  ;;  %599 = vmatprep.mubr.f32.mxu1 %v1236_v46 }
 0x197   : > { %v469_v30 = vadd.f32 0.5, %v462_v29 }
 0x198   : > { %v1038_v31 = vpop.eup %1037 }
 0x199   : > { %600 = vmatmul.mubr.f32.gmra.mrb[6].mxu1 %v469_v30  ;;  %v463_v32 = vmul.f32 0.5, %v1038_v31 }
 0x19a   : > { %605 = vmatprep.mubr.f32.mxu1 %v1236_v46 }
 0x19b   : > { %v470_v33 = vadd.f32 0.5, %v463_v32 }
 0x19c   : > { %v1040_v34 = vpop.eup %1039 }
 0x19d   : > { %606 = vmatmul.mubr.f32.gmra.mrb[8].mxu1 %v470_v33  ;;  %v464_v35 = vmul.f32 0.5, %v1040_v34 }
 0x19e   : > { %611 = vmatprep.mubr.f32.mxu1 %v1236_v46 }
 0x19f   : > { %v471_v36 = vadd.f32 0.5, %v464_v35 }
 0x1a0   : > { %v1042_v37 = vpop.eup %1041 }
 0x1a1   : > { %612 = vmatmul.mubr.f32.gmra.mrb[10].mxu1 %v471_v36  ;;  %v465_v38 = vmul.f32 0.5, %v1042_v37 }
 0x1a2   : > { %617 = vmatprep.mubr.f32.mxu1 %v1236_v46 }
 0x1a3   : > { %v472_v39 = vadd.f32 0.5, %v465_v38 }
 0x1a5   : > { %618 = vmatmul.mubr.f32.gmra.mrb[12].mxu1 %v472_v39 }
 0x260   : > { %v583_v48 = vpop.f32.mrb[0].mxu1 }
 0x261   : > { %v584_v49 = vadd.f32 %v583_v48, %v1482_v45  ;;  %v585_v50 = vpop.f32.mrb[1].mxu1 }
 0x262   : > { %v586_v46 = vadd.f32 %v585_v50, %v1484_v47 }
 0x263   : > { %v624_v51 = vmul.f32 0.5, %v584_v49 }
 0x264   : > { %v625_v52 = vmul.f32 0.5, %v586_v46  ;;  %v589_v53 = vpop.f32.mrb[2].mxu1 }
 0x265   : > { %1043 = vtanh.f32 %v624_v51  ;;  %v590_v54 = vadd.f32 %v589_v53, %v1482_v45  ;;  %v591_v55 = vpop.f32.mrb[3].mxu1 }
 0x266   : > { %1045 = vtanh.f32 %v625_v52  ;;  %v592_v56 = vadd.f32 %v591_v55, %v1484_v47 }
 0x267   : > { %v626_v57 = vmul.f32 0.5, %v590_v54 }
 0x268   : > { %v627_v58 = vmul.f32 0.5, %v592_v56  ;;  %v595_v59 = vpop.f32.mrb[4].mxu1 }
 0x269   : > { %1047 = vtanh.f32 %v626_v57  ;;  %v596_v60 = vadd.f32 %v595_v59, %v1482_v45  ;;  %v597_v61 = vpop.f32.mrb[5].mxu1 }
 0x26a   : > { %1049 = vtanh.f32 %v627_v58  ;;  %v598_v62 = vadd.f32 %v597_v61, %v1484_v47 }
 0x26b   : > { %v628_v63 = vmul.f32 0.5, %v596_v60 }
 0x26c   : > { %v629_v0 = vmul.f32 0.5, %v598_v62  ;;  %v601_v1 = vpop.f32.mrb[6].mxu1 }
 0x26d   : > { %1051 = vtanh.f32 %v628_v63  ;;  %v602_v2 = vadd.f32 %v601_v1, %v1482_v45  ;;  %v603_v3 = vpop.f32.mrb[7].mxu1 }
 0x26e   : > { %1053 = vtanh.f32 %v629_v0  ;;  %v604_v4 = vadd.f32 %v603_v3, %v1484_v47 }
 0x26f   : > { %v1044_v5 = vpop.eup %1043  ;;  %v630_v6 = vmul.f32 0.5, %v602_v2 }
 0x270   : > { %v1046_v7 = vpop.eup %1045  ;;  %v652_v8 = vmul.f32 0.5, %v1044_v5  ;;  %v631_v9 = vmul.f32 0.5, %v604_v4  ;;  %v607_v10 = vpop.f32.mrb[8].mxu1 }
 0x271   : > { %v653_v11 = vmul.f32 0.5, %v1046_v7  ;;  %1055 = vtanh.f32 %v630_v6  ;;  %v608_v12 = vadd.f32 %v607_v10, %v1482_v45  ;;  %v609_v13 = vpop.f32.mrb[9].mxu1 }
 0x272   : > { %v666_v14 = vadd.f32 0.5, %v652_v8  ;;  %1057 = vtanh.f32 %v631_v9  ;;  %v610_v15 = vadd.f32 %v609_v13, %v1484_v47 }
 0x273   : > { %v1048_v16 = vpop.eup %1047  ;;  %v667_v17 = vadd.f32 0.5, %v653_v11  ;;  %v632_v18 = vmul.f32 0.5, %v608_v12 }
 0x274   : > { %v1050_v19 = vpop.eup %1049  ;;  %680 = vst [vmem:[%s1498_s26] sm:$0xff] %v666_v14  ;;  %v654_v20 = vmul.f32 0.5, %v1048_v16  ;;  %v633_v21 = vmul.f32 0.5, %v610_v15  ;;  %v613_v22 = vpop.f32.mrb[10].mxu1 }
 0x275   : > { %681 = vst [vmem:[%s1498_s26 + $0x8] sm:$0xff] %v667_v17  ;;  %v655_v23 = vmul.f32 0.5, %v1050_v19  ;;  %1059 = vtanh.f32 %v632_v18  ;;  %v614_v24 = vadd.f32 %v613_v22, %v1482_v45  ;;  %v615_v25 = vpop.f32.mrb[11].mxu1 }
 0x276   : > { %v668_v26 = vadd.f32 0.5, %v654_v20  ;;  %1061 = vtanh.f32 %v633_v21  ;;  %v616_v27 = vadd.f32 %v615_v25, %v1484_v47 }
 0x277   : > { %v1052_v28 = vpop.eup %1051  ;;  %v669_v29 = vadd.f32 0.5, %v655_v23  ;;  %v634_v30 = vmul.f32 0.5, %v614_v24 }
 0x278   : > { %v1054_v31 = vpop.eup %1053  ;;  %682 = vst [vmem:[%s1498_s26 + $0x10] sm:$0xff] %v668_v26  ;;  %v656_v32 = vmul.f32 0.5, %v1052_v28  ;;  %v635_v33 = vmul.f32 0.5, %v616_v27  ;;  %v619_v34 = vpop.f32.mrb[12].mxu1 }
 0x279   : > { %683 = vst [vmem:[%s1498_s26 + $0x18] sm:$0xff] %v669_v29  ;;  %v657_v35 = vmul.f32 0.5, %v1054_v31  ;;  %1063 = vtanh.f32 %v634_v30  ;;  %v620_v36 = vadd.f32 %v619_v34, %v1482_v45  ;;  %v621_v37 = vpop.f32.mrb[13].mxu1 }
 0x27a   : > { %v670_v38 = vadd.f32 0.5, %v656_v32  ;;  %1065 = vtanh.f32 %v635_v33  ;;  %v622_v39 = vadd.f32 %v621_v37, %v1484_v47 }
 0x27b   : > { %v1056_v40 = vpop.eup %1055  ;;  %v671_v41 = vadd.f32 0.5, %v657_v35  ;;  %v636_v42 = vmul.f32 0.5, %v620_v36 }
 0x27c   : > { %v1058_v43 = vpop.eup %1057  ;;  %684 = vst [vmem:[%s1498_s26 + $0x20] sm:$0xff] %v670_v38  ;;  %v658_v44 = vmul.f32 0.5, %v1056_v40  ;;  %v637_v48 = vmul.f32 0.5, %v622_v39 }
 0x27d   : > { %685 = vst [vmem:[%s1498_s26 + $0x28] sm:$0xff] %v671_v41  ;;  %v659_v49 = vmul.f32 0.5, %v1058_v43  ;;  %1067 = vtanh.f32 %v636_v42 }
 0x27e   : > { %v672_v45 = vadd.f32 0.5, %v658_v44  ;;  %1069 = vtanh.f32 %v637_v48 }
 0x27f   : > { %v1060_v50 = vpop.eup %1059  ;;  %v673_v46 = vadd.f32 0.5, %v659_v49 }
 0x280   : > { %v1062_v51 = vpop.eup %1061  ;;  %686 = vst [vmem:[%s1498_s26 + $0x30] sm:$0xff] %v672_v45  ;;  %v660_v47 = vmul.f32 0.5, %v1060_v50 }
 0x281   : > { %687 = vst [vmem:[%s1498_s26 + $0x38] sm:$0xff] %v673_v46  ;;  %v661_v52 = vmul.f32 0.5, %v1062_v51 }
 0x282   : > { %v674_v53 = vadd.f32 0.5, %v660_v47 }
 0x283   : > { %v1064_v54 = vpop.eup %1063  ;;  %v675_v55 = vadd.f32 0.5, %v661_v52 }
 0x284   : > { %v1066_v56 = vpop.eup %1065  ;;  %688 = vst [vmem:[%s1498_s26 + $0x40] sm:$0xff] %v674_v53  ;;  %v662_v57 = vmul.f32 0.5, %v1064_v54 }
 0x285   : > { %689 = vst [vmem:[%s1498_s26 + $0x48] sm:$0xff] %v675_v55  ;;  %v663_v58 = vmul.f32 0.5, %v1066_v56 }
 0x286   : > { %v676_v59 = vadd.f32 0.5, %v662_v57 }
 0x287   : > { %v1068_v60 = vpop.eup %1067  ;;  %v677_v61 = vadd.f32 0.5, %v663_v58  ;;  %701 = sbr.rel (!%p1601_p8) target bundleno = 682 (0x2aa), region = 56 }
 0x288   : > { %v1070_v62 = vpop.eup %1069  ;;  %690 = vst [vmem:[%s1498_s26 + $0x50] sm:$0xff] %v676_v59  ;;  %v664_v63 = vmul.f32 0.5, %v1068_v60 }
 0x289   : > { %691 = vst [vmem:[%s1498_s26 + $0x58] sm:$0xff] %v677_v61  ;;  %v665_v0 = vmul.f32 0.5, %v1070_v62 }
 0x28a   : > { %v678_v1 = vadd.f32 0.5, %v664_v63 }
 0x28b   : > { %v679_v2 = vadd.f32 0.5, %v665_v0 }
 0x28c   : > { %692 = vst [vmem:[%s1498_s26 + $0x60] sm:$0xff] %v678_v1 }
 0x28d   : > { %693 = vst [vmem:[%s1498_s26 + $0x68] sm:$0xff] %v679_v2 }
 0x28e   : > { %s1611_s10 = smov (!%p704_p9, %s703_s10), 7 }
 0x28f   : > { %s1522_s12 = sshll.u32 %s1611_s10, 8 }
 0x290   : > { %s709_s28 = ssub.s32 1792, %s1522_s12 }
 0x291   : > { %710 = vsyncadd %s695_s8, %s709_s28  ;;  %p826_p10 = scmp.ne.s32.totalorder %s1522_s12, 0  ;;  %s840_s30 = smul.u32 1792, %s1291_s22 }
 0x292   : > { %s716_s9 = sshll.u32 %s1498_s26, 4  ;;  %s1237_s16 = smov [#allocation8]   ;;  %s1535_s9 = int_to_ptr.vmem [resolvable:$true] %s716_s9 }
 0x293   : > { %s1533_s14 = scalar_lea.hbm %s1585_s5, %s840_s30  ;;  %s1155_s15 = scalar_lea.vmem %s1535_s9, %s1522_s12 }
 0x294   : > { %p1156_p1 = scmp.ne.s32.totalorder %s1535_s9, %s1155_s15  ;;  %s1159_s29 = sshll.u32 %s1237_s16, 4  ;;  %s1160_s29 = int_to_ptr.vmem [resolvable:$false] %s1159_s29 }
 0x295   : > { %s1161_s22 = scalar_lea.vmem %s1160_s29, 3584  ;;  %p1162_p5 = scmp.lt.s32.totalorder %s1535_s9, %s1160_s29 }
 0x296   : > { %p1157_p4 = pnand %p1156_p1, %p826_p10  ;;  %p1163_p6 = scmp.lt.s32.totalorder %s1161_s22, %s1155_s15 }
 0x298   : > { %p1158_p3 = pneg %p1157_p4  ;;  %p1164_p11 = por %p1163_p6, %p1162_p5 }
 0x29a   : > { %p1165_p13 = pnand %p1164_p11, %p1158_p3 }
 0x29c   : > { %1168 = shalt.err (!%p1165_p13)
}
 0x29d   : > { %s1169_s7 = scalar_lea.hbm %s1533_s14, %s1522_s12  ;;  %s1173_s26 = scalar_lea.hbm %s1585_s5, 6400 }
 0x29e   : > { %p1170_p12 = scmp.ne.s32.totalorder %s1533_s14, %s1169_s7  ;;  %p1174_p7 = scmp.lt.u32.totalorder %s1533_s14, %s1585_s5 }
 0x29f   : > { %p1175_p8 = scmp.lt.u32.totalorder %s1173_s26, %s1169_s7  ;;  %p1177_p1 = scmp.lt.u32.totalorder %s1169_s7, %s1533_s14 }
 0x2a0   : > { %p1171_p0 = pnand %p1170_p12, %p826_p10 }
 0x2a1   : > { %p1176_p9 = por %p1175_p8, %p1174_p7 }
 0x2a2   : > { %p1172_p2 = pneg %p1171_p0 }
 0x2a3   : > { %p1178_p4 = por %p1177_p1, %p1176_p9 }
 0x2a5   : > { %p1179_p3 = pnand %p1178_p4, %p1172_p2 }
 0x2a7   : > { %1182 = shalt.err (!%p1179_p3)
}
 0x2a8   : > { %s1238_s28 = smov 256   ;;  %s1239_s30 = smov 16  }
 0x2a9   : > { %722 = dma.vmem_to_hbm [thread:$0]  (%p826_p10), %s1535_s9, %s1522_s12, %s1533_s14, %s695_s8, %s1238_s28, %s1238_s28, %s1239_s30  }
 0x2aa PF: > { %p985_p5 = scmp.ge.s32.totalorder %s1225_s21, 2  ;;  %s731_s27 = sand.u32 1, %s1213_s18  }
 0x2ab   : > { %p1602_p6 = scmp.ne.s32.totalorder %s1593_s6, 0  ;;  %s732_s11 = scalar_lea.sflag [#allocation4], %s731_s27 }
 0x2ad   : > { %p978_p11 = pnand %p985_p5, %p1602_p6 }
 0x2af   : > { %1208 = dma.done.wait (!%p978_p11), %s732_s11, 1792  }
 0x2b0   : > { %1210 = vsyncadd (!%p978_p11), %s732_s11, 4294965504  ;;  %s1603_s15 = sld [smem:[#allocation12_spill]]  ;;  %p19_p13 = scmp.ge.s32.totalorder %s1295_s24, 6  }
 0x2b1   : > { %s1604_s18 = smov %s1217_s19  ;;  %s1605_s19 = smov %s1221_s20 }
 0x2b2   : > { %s1607_s21 = smov %s1295_s24  ;;  %21 = sbr.rel (!%p19_p13) target bundleno = 6 (0x6), region = 93 }
 0x2b6   : > { %s1606_s20 = smov %s1603_s15 }
 0x2b9   :  { %737 = vsyncpa [#allocation3], 1 }
 0x2ba   :  { %739 = vsyncpa [#allocation3 + $0x1], 1 }
 0x2bb   :  { %740 = vsyncpa [#allocation6], 1 }
 0x2bc   :  { %741 = vsyncpa [#allocation4], 1 }
 0x2bd   :  { %743 = vsyncpa [#allocation4 + $0x1], 1 }

</bundles_post_ra>
